<compile_context>
chip_gen: v5e
topology: v5e:2x2
jax: 0.10.0
libtpu: 0.0.40
codegen_flags: <defaults>
</compile_context>

<pallas_src>
import jax
import jax.numpy as jnp
from jax.experimental import pallas as pl
from jax.experimental.pallas import tpu as pltpu

LN_EPS = 1e-5


def _round_up(x, m):
    return ((x + m - 1) // m) * m


def _pooler_end_logits_kernel(hs_ref, sp_ref, w0a_ref, w0b_ref, b0_ref,
                              w1_ref, b1_ref, o_ref):
    # hs_ref: [TM, Hh], sp_ref: [TM, Hs]
    # w0a_ref: [Hh, H], w0b_ref: [Hs, H], b0_ref: [1, H]
    # w1_ref: [H, C_pad] (gamma folded), b1_ref: [1, C_pad] (beta folded)
    # o_ref: [TM, C_pad]

    # dense_0 with the concat fused: concat([hs, sp]) @ w0 == hs@w0_top + sp@w0_bot.
    # Native-dtype MXU operands, f32 accumulation.
    # (Hs may be small; keeping it on the MXU is still a single result-pop pass.)
    h = jnp.dot(hs_ref[...], w0a_ref[...], preferred_element_type=jnp.float32)
    h = h + jnp.dot(sp_ref[...], w0b_ref[...], preferred_element_type=jnp.float32)
    h = h + b0_ref[...].astype(jnp.float32)

    # tanh (EUP) in f32
    h = jnp.tanh(h)

    # Single-pass LayerNorm statistics: mean and E[x^2] reduce independently.
    inv_h = 1.0 / h.shape[-1]
    mean = jnp.sum(h, axis=-1, keepdims=True) * inv_h
    ex2 = jnp.sum(h * h, axis=-1, keepdims=True) * inv_h
    var = ex2 - mean * mean
    h = (h - mean) * jax.lax.rsqrt(var + LN_EPS)
    # gamma/beta are already folded into w1/b1 (prep time), so no affine here.

    # dense_1 (cast LN result to the weight dtype so bf16 weights use the MXU
    # fast path; no-op for f32 weights). Lane-dense [TM, C_pad] store.
    out = jnp.dot(h.astype(w1_ref.dtype), w1_ref[...],
                  preferred_element_type=jnp.float32)
    out = out + b1_ref[...].astype(jnp.float32)
    o_ref[...] = out.astype(o_ref.dtype)


def prepare_params(params, num_hidden_features):
    """One-time weight preprocessing (hoist out of the per-call forward).

    Splits w0 for the fused concat, folds the LayerNorm affine into dense_1,
    and lane-pads dense_1 to a multiple of 128.
    """
    w0, b0 = params["w0"], params["b0"]
    gamma, beta = params["gamma"], params["beta"]
    w1, b1 = params["w1"], params["b1"]
    H = w0.shape[0]
    C = w1.shape[1]
    Hh = int(num_hidden_features)
    Hs = H - Hh
    assert 0 < Hh < H and Hs > 0, "concat split must be inside hidden_size"

    w0_top = w0[:Hh, :]
    w0_bot = w0[Hh:, :]

    # Fold LN affine into dense_1 (f32 math, cast back):
    #   (norm*gamma + beta) @ w1 + b1 == norm @ (gamma[:,None]*w1) + (beta@w1 + b1)
    g = gamma.reshape(H).astype(jnp.float32)
    bt = beta.reshape(1, H).astype(jnp.float32)
    w1_f32 = w1.astype(jnp.float32)
    w1_f = (g[:, None] * w1_f32).astype(w1.dtype)
    b1_f = (bt @ w1_f32 + b1.reshape(1, C).astype(jnp.float32)).astype(b1.dtype)

    # Lane-dense dense_1 output: pad classes to a multiple of 128.
    C_pad = _round_up(max(C, 1), 128)
    w1_p = jnp.pad(w1_f, ((0, 0), (0, C_pad - C)))
    b1_p = jnp.pad(b1_f, ((0, 0), (0, C_pad - C)))

    return dict(w0_top=w0_top, w0_bot=w0_bot, b0=b0.reshape(1, H),
                w1=w1_p, b1=b1_p, num_classes=C)


def pooler_end_logits(hidden_states, start_positions, params, *, tm=None):
    """hidden_states: [B, S, Hh], start_positions: [B, S, Hs], Hh + Hs == hidden_size.

    `params` may be raw (init_params output) or preprocessed (prepare_params
    output). Preprocess once and reuse to avoid per-call weight slicing/padding.
    """
    if "w0_top" not in params:
        params = prepare_params(params, hidden_states.shape[-1])

    w0_top, w0_bot, b0 = params["w0_top"], params["w0_bot"], params["b0"]
    w1_p, b1_p, C = params["w1"], params["b1"], params["num_classes"]

    B, S, Hh = hidden_states.shape
    Hs = start_positions.shape[-1]
    H = w0_top.shape[1]
    assert w0_top.shape[0] == Hh and w0_bot.shape[0] == Hs and Hh + Hs == H, \
        "concat feature dim must equal hidden_size"
    C_pad = w1_p.shape[1]
    M = B * S

    hs2d = hidden_states.reshape(M, Hh)
    sp2d = start_positions.reshape(M, Hs)

    # Row tile: ~512-row tiles rounded to the dtype's sublane tile, with at
    # least 2 grid steps (so the "parallel" axis shards across v7x's 2 TCs).
    # The ragged last block is handled by Pallas -> no activation pad pass.
    act_item = jnp.dtype(hidden_states.dtype).itemsize
    sub = {4: 8, 2: 16, 1: 32}.get(act_item, 8)
    if tm is None:
        n_steps = max(pl.cdiv(M, 512), 2 if M >= 2 * sub else 1)
        tm = min(512, _round_up(pl.cdiv(M, n_steps), sub))
    grid_m = pl.cdiv(M, tm)

    # VMEM budget: single-buffered resident weights + double-buffered
    # activation/output tiles + f32 temporaries + headroom, capped at 85% of
    # this generation's physical VMEM capacity.
    w_item = jnp.dtype(w0_top.dtype).itemsize
    weight_bytes = ((w0_top.size + w0_bot.size + b0.size) * w_item
                    + (w1_p.size + b1_p.size) * jnp.dtype(w1_p.dtype).itemsize)
    tile_bytes = 2 * tm * (Hh + Hs + C_pad) * act_item      # double-buffered act/out
    fp32_scratch = 3 * tm * H * 4 + tm * C_pad * 4           # in-kernel f32 temps
    needed = weight_bytes + tile_bytes + fp32_scratch + (4 << 20)
    try:
        vmem_cap = int(pltpu.get_tpu_info().vmem_capacity_bytes * 0.85)
    except Exception:
        vmem_cap = int((64 << 20) * 0.85)   # conservative fallback (v7x-sized)
    vmem_limit = int(min(vmem_cap, max(needed, 32 << 20)))

    resident = dict(pipeline_mode=pl.Buffered(1))   # weights: no double buffer

    out2d = pl.pallas_call(
        _pooler_end_logits_kernel,
        out_shape=jax.ShapeDtypeStruct((M, C_pad), hidden_states.dtype),
        grid=(grid_m,),
        in_specs=[
            pl.BlockSpec((tm, Hh), lambda i: (i, 0)),                 # hidden tile
            pl.BlockSpec((tm, Hs), lambda i: (i, 0)),                 # start tile
            pl.BlockSpec((Hh, H), lambda i: (0, 0), **resident),      # w0_top
            pl.BlockSpec((Hs, H), lambda i: (0, 0), **resident),      # w0_bot
            pl.BlockSpec((1, H), lambda i: (0, 0), **resident),       # b0
            pl.BlockSpec((H, C_pad), lambda i: (0, 0), **resident),   # w1 (folded, padded)
            pl.BlockSpec((1, C_pad), lambda i: (0, 0), **resident),   # b1 (folded, padded)
        ],
        out_specs=pl.BlockSpec((tm, C_pad), lambda i: (i, 0)),
        compiler_params=pltpu.CompilerParams(
            dimension_semantics=("parallel",),        # 2-TC sharding on v7x
            vmem_limit_bytes=vmem_limit),
    )(hs2d, sp2d, w0_top, w0_bot, b0, w1_p, b1_p)

    return out2d[:, :C].reshape(B, S, C)


def init_params(key, hidden_size, num_classes, dtype=jnp.float32):
    k0, k1, k2, k3, k4, k5 = jax.random.split(key, 6)
    # nn.Linear-style init (uniform(-1/sqrt(fan_in), 1/sqrt(fan_in))) — deterministic.
    lim = 1.0 / (hidden_size ** 0.5)
    w0 = jax.random.uniform(k0, (hidden_size, hidden_size), dtype, -lim, lim)
    b0 = jax.random.uniform(k1, (1, hidden_size), dtype, -lim, lim)
    # Non-trivial LN affine so the gamma/beta -> dense_1 fold is exercised.
    gamma = (1.0 + 0.1 * jax.random.normal(k4, (1, hidden_size))).astype(dtype)
    beta = (0.1 * jax.random.normal(k5, (1, hidden_size))).astype(dtype)
    w1 = jax.random.uniform(k2, (hidden_size, num_classes), dtype, -lim, lim)
    b1 = jax.random.uniform(k3, (1, num_classes), dtype, -lim, lim)
    return dict(w0=w0, b0=b0, gamma=gamma, beta=beta, w1=w1, b1=b1)


def _reference(hidden_states, start_positions, p):
    x = jnp.concatenate([hidden_states, start_positions], axis=-1)
    x = x @ p["w0"] + p["b0"][0]
    x = jnp.tanh(x)
    mean = jnp.mean(x, axis=-1, keepdims=True)
    var = jnp.mean((x - mean) ** 2, axis=-1, keepdims=True)
    x = (x - mean) / jnp.sqrt(var + LN_EPS) * p["gamma"][0] + p["beta"][0]
    return x @ p["w1"] + p["b1"][0]


if __name__ == "__main__":
    B, S = 2, 8
    hidden_size = 32
    num_classes = 4
    Hh = hidden_size // 2
    Hs = hidden_size - Hh

    key = jax.random.PRNGKey(0)
    k_h, k_s, k_p = jax.random.split(key, 3)
    hidden_states = jax.random.normal(k_h, (B, S, Hh), jnp.float32)
    start_positions = jax.random.normal(k_s, (B, S, Hs), jnp.float32)
    params = init_params(k_p, hidden_size, num_classes)

    # One-time weight preprocessing, hoisted out of the forward path.
    prepped = prepare_params(params, Hh)

    out = pooler_end_logits(hidden_states, start_positions, prepped)
    out = jax.block_until_ready(out)

    ref = _reference(hidden_states, start_positions, params)
    assert out.shape == (B, S, num_classes)
    assert jnp.allclose(out, ref, atol=1e-4, rtol=1e-4), "mismatch vs reference"

    print("KERNEL_OK")
</pallas_src>

<mosaic_0001>
module attributes {stable_mosaic.version = 11 : i64} {
  func.func @_pooler_end_logits_kernel(%arg0: i32, %arg1: memref<8x16xf32, #tpu.memory_space<vmem>>, %arg2: memref<8x16xf32, #tpu.memory_space<vmem>>, %arg3: memref<16x32xf32, #tpu.memory_space<vmem>>, %arg4: memref<16x32xf32, #tpu.memory_space<vmem>>, %arg5: memref<1x32xf32, #tpu.memory_space<vmem>>, %arg6: memref<32x128xf32, #tpu.memory_space<vmem>>, %arg7: memref<1x128xf32, #tpu.memory_space<vmem>>, %arg8: memref<8x128xf32, #tpu.memory_space<vmem>>) attributes {dimension_semantics = [#tpu.dimension_semantics<parallel>], iteration_bounds = array<i64: 2>, scalar_prefetch = 0 : i64, scratch_operands = 0 : i64, tpu.core_type = #tpu.core_type<tc>, window_params = [{transform_indices = @transform_0, window_bounds = array<i64: 8, 16>}, {transform_indices = @transform_1, window_bounds = array<i64: 8, 16>}, {pipeline_mode = #tpu.pipeline_mode<synchronous>, transform_indices = @transform_2, window_bounds = array<i64: 16, 32>}, {pipeline_mode = #tpu.pipeline_mode<synchronous>, transform_indices = @transform_3, window_bounds = array<i64: 16, 32>}, {pipeline_mode = #tpu.pipeline_mode<synchronous>, transform_indices = @transform_4, window_bounds = array<i64: 1, 32>}, {pipeline_mode = #tpu.pipeline_mode<synchronous>, transform_indices = @transform_5, window_bounds = array<i64: 32, 128>}, {pipeline_mode = #tpu.pipeline_mode<synchronous>, transform_indices = @transform_6, window_bounds = array<i64: 1, 128>}, {transform_indices = @transform_7, window_bounds = array<i64: 8, 128>}]} {
    %c0 = arith.constant 0 : index
    %c0_0 = arith.constant 0 : index
    %0 = vector.load %arg1[%c0, %c0_0] : memref<8x16xf32, #tpu.memory_space<vmem>>, vector<8x16xf32>
    %c0_1 = arith.constant 0 : index
    %c0_2 = arith.constant 0 : index
    %1 = vector.load %arg3[%c0_1, %c0_2] : memref<16x32xf32, #tpu.memory_space<vmem>>, vector<16x32xf32>
    %cst = arith.constant dense<0.000000e+00> : vector<8x32xf32>
    %2 = tpu.matmul %0, %1, %cst {dimension_numbers = #tpu.dot_dimension_numbers<[1], [0], [0], [1], [0, 0, 1, 1], [], []>} : vector<8x16xf32>, vector<16x32xf32>, vector<8x32xf32> -> vector<8x32xf32>
    %c0_3 = arith.constant 0 : index
    %c0_4 = arith.constant 0 : index
    %3 = vector.load %arg2[%c0_3, %c0_4] : memref<8x16xf32, #tpu.memory_space<vmem>>, vector<8x16xf32>
    %c0_5 = arith.constant 0 : index
    %c0_6 = arith.constant 0 : index
    %4 = vector.load %arg4[%c0_5, %c0_6] : memref<16x32xf32, #tpu.memory_space<vmem>>, vector<16x32xf32>
    %cst_7 = arith.constant dense<0.000000e+00> : vector<8x32xf32>
    %5 = tpu.matmul %3, %4, %cst_7 {dimension_numbers = #tpu.dot_dimension_numbers<[1], [0], [0], [1], [0, 0, 1, 1], [], []>} : vector<8x16xf32>, vector<16x32xf32>, vector<8x32xf32> -> vector<8x32xf32>
    %6 = arith.addf %2, %5 : vector<8x32xf32>
    %c0_8 = arith.constant 0 : index
    %c0_9 = arith.constant 0 : index
    %7 = vector.load %arg5[%c0_8, %c0_9] : memref<1x32xf32, #tpu.memory_space<vmem>>, vector<1x32xf32>
    %8 = vector.broadcast %7 : vector<1x32xf32> to vector<8x32xf32>
    %9 = arith.addf %6, %8 : vector<8x32xf32>
    %10 = math.tanh %9 : vector<8x32xf32>
    %cst_10 = arith.constant dense<0.000000e+00> : vector<8xf32>
    %11 = vector.multi_reduction <add>, %10, %cst_10 [1] : vector<8x32xf32> to vector<8xf32>
    %12 = vector.shape_cast %11 : vector<8xf32> to vector<8x1xf32>
    %cst_11 = arith.constant 3.125000e-02 : f32
    %13 = vector.broadcast %cst_11 : f32 to vector<8x1xf32>
    %14 = arith.mulf %12, %13 : vector<8x1xf32>
    %15 = arith.mulf %10, %10 : vector<8x32xf32>
    %cst_12 = arith.constant dense<0.000000e+00> : vector<8xf32>
    %16 = vector.multi_reduction <add>, %15, %cst_12 [1] : vector<8x32xf32> to vector<8xf32>
    %17 = vector.shape_cast %16 : vector<8xf32> to vector<8x1xf32>
    %cst_13 = arith.constant 3.125000e-02 : f32
    %18 = vector.broadcast %cst_13 : f32 to vector<8x1xf32>
    %19 = arith.mulf %17, %18 : vector<8x1xf32>
    %20 = arith.mulf %14, %14 : vector<8x1xf32>
    %21 = arith.subf %19, %20 : vector<8x1xf32>
    %22 = vector.broadcast %14 : vector<8x1xf32> to vector<8x32xf32>
    %23 = arith.subf %10, %22 : vector<8x32xf32>
    %cst_14 = arith.constant 9.99999974E-6 : f32
    %24 = vector.broadcast %cst_14 : f32 to vector<8x1xf32>
    %25 = arith.addf %21, %24 : vector<8x1xf32>
    %26 = math.rsqrt %25 : vector<8x1xf32>
    %27 = vector.broadcast %26 : vector<8x1xf32> to vector<8x32xf32>
    %28 = arith.mulf %23, %27 : vector<8x32xf32>
    %c0_15 = arith.constant 0 : index
    %c0_16 = arith.constant 0 : index
    %29 = vector.load %arg6[%c0_15, %c0_16] : memref<32x128xf32, #tpu.memory_space<vmem>>, vector<32x128xf32>
    %cst_17 = arith.constant dense<0.000000e+00> : vector<8x128xf32>
    %30 = tpu.matmul %28, %29, %cst_17 {dimension_numbers = #tpu.dot_dimension_numbers<[1], [0], [0], [1], [0, 0, 1, 1], [], []>} : vector<8x32xf32>, vector<32x128xf32>, vector<8x128xf32> -> vector<8x128xf32>
    %c0_18 = arith.constant 0 : index
    %c0_19 = arith.constant 0 : index
    %31 = vector.load %arg7[%c0_18, %c0_19] : memref<1x128xf32, #tpu.memory_space<vmem>>, vector<1x128xf32>
    %32 = vector.broadcast %31 : vector<1x128xf32> to vector<8x128xf32>
    %33 = arith.addf %30, %32 : vector<8x128xf32>
    %c0_20 = arith.constant 0 : index
    %c0_21 = arith.constant 0 : index
    %34 = vector.load %arg8[%c0_20, %c0_21] : memref<8x128xf32, #tpu.memory_space<vmem>>, vector<8x128xf32>
    tpu.vector_store %arg8[%c0_20, %c0_21], %33 {strides = array<i32>} : memref<8x128xf32, #tpu.memory_space<vmem>>, vector<8x128xf32>,
    return
  }
  func.func @transform_0(%arg0: i32) -> (i32, i32) {
    %c0_i32 = arith.constant 0 : i32
    %c0_i32_0 = arith.constant 0 : i32
    return %arg0, %c0_i32 : i32, i32
  }
  func.func @transform_1(%arg0: i32) -> (i32, i32) {
    %c0_i32 = arith.constant 0 : i32
    %c0_i32_0 = arith.constant 0 : i32
    return %arg0, %c0_i32 : i32, i32
  }
  func.func @transform_2(%arg0: i32) -> (i32, i32) {
    %c0_i32 = arith.constant 0 : i32
    %c0_i32_0 = arith.constant 0 : i32
    %c0_i32_1 = arith.constant 0 : i32
    return %c0_i32, %c0_i32_0 : i32, i32
  }
  func.func @transform_3(%arg0: i32) -> (i32, i32) {
    %c0_i32 = arith.constant 0 : i32
    %c0_i32_0 = arith.constant 0 : i32
    %c0_i32_1 = arith.constant 0 : i32
    return %c0_i32, %c0_i32_0 : i32, i32
  }
  func.func @transform_4(%arg0: i32) -> (i32, i32) {
    %c0_i32 = arith.constant 0 : i32
    %c0_i32_0 = arith.constant 0 : i32
    %c0_i32_1 = arith.constant 0 : i32
    return %c0_i32, %c0_i32_0 : i32, i32
  }
  func.func @transform_5(%arg0: i32) -> (i32, i32) {
    %c0_i32 = arith.constant 0 : i32
    %c0_i32_0 = arith.constant 0 : i32
    %c0_i32_1 = arith.constant 0 : i32
    return %c0_i32, %c0_i32_0 : i32, i32
  }
  func.func @transform_6(%arg0: i32) -> (i32, i32) {
    %c0_i32 = arith.constant 0 : i32
    %c0_i32_0 = arith.constant 0 : i32
    %c0_i32_1 = arith.constant 0 : i32
    return %c0_i32, %c0_i32_0 : i32, i32
  }
  func.func @transform_7(%arg0: i32) -> (i32, i32) {
    %c0_i32 = arith.constant 0 : i32
    %c0_i32_0 = arith.constant 0 : i32
    return %arg0, %c0_i32 : i32, i32
  }
}

</mosaic_0001>

<bundles_post_ra>
// kernel: tpu_custom_call.1
= control target key start
LH: loop header
LB: loop body
LE: loop exit
PB: predicated region body
PF: predicated region fallthrough
CT: control target
= control target key end

     0   :  { %s1225_s0 = inlined_call_operand.hbm [shape: f32[16,16], index: 0, kind: input, shape index: {}]   ;;  %s1226_s1 = inlined_call_operand.hbm [shape: f32[16,16], index: 1, kind: input, shape index: {}]   ;;  %s1227_s2 = inlined_call_operand.hbm [shape: f32[16,32], index: 2, kind: input, shape index: {}]   ;;  %s1228_s3 = inlined_call_operand.hbm [shape: f32[16,32], index: 3, kind: input, shape index: {}]   ;;  %s1229_s4 = inlined_call_operand.vmem [shape: f32[1,32], index: 4, kind: input, shape index: {}]   ;;  %s1230_s5 = inlined_call_operand.hbm [shape: f32[32,128], index: 5, kind: input, shape index: {}]   ;;  %s1231_s6 = inlined_call_operand.vmem [shape: f32[1,128], index: 6, kind: input, shape index: {}]   ;;  %s1232_s7 = inlined_call_operand.hbm [shape: f32[16,128], index: 7, kind: output, shape index: {}]  }
   0x1   :  { %1236 = sst [smem:[#allocation20_spill]] %s1227_s2 }
   0x2   :  { %1237 = sst [smem:[#allocation21_spill]] %s1228_s3 }
   0x3   :  { %1238 = sst [smem:[#allocation22_spill]] %s1230_s5 }
   0x4   :  { %12 = vsyncpa [#allocation3], 0 }
   0x5   :  { %14 = vsyncpa [#allocation3 + $0x1], 0 }
   0x6   :  { %15 = vsyncpa [#allocation6], 0 }
   0x7   :  { %17 = vsyncpa [#allocation6 + $0x1], 0 }
   0x8   :  { %18 = vsyncpa [#allocation9], 0 }
   0x9   :  { %19 = vsyncpa [#allocation4], 0 }
   0xa   :  { %21 = vsyncpa [#allocation4 + $0x1], 0  ;;  %s1026_s24 = smov 0   ;;  %s1028_s25 = smov 0  }
   0xb   :  { %s1030_s26 = smov 0   ;;  %s1032_s27 = smov 0  }
   0xc LB: > { %1239 = sst [smem:[#allocation17_spill]] %s975_s26  ;;  %s1050_s8 = sadd.s32 4294967295, %s979_s27   ;;  %s979_s27 = sphi %s1032_s27, %s1253_s27   ;;  %s975_s26 = sphi %s1030_s26, %s1255_s26   ;;  %s971_s25 = sphi %s1028_s25, %s1257_s25   ;;  %s967_s24 = sphi %s1026_s24, %s1256_s24  }
   0xd   : > { %s1240_s2 = sld [smem:[#allocation20_spill]]  ;;  %p638_p0 = scmp.ge.s32.totalorder %s979_s27, 1 }
   0xe   : > { %p48_p1 = scmp.eq.s32.totalorder %s1050_s8, 0  ;;  %p215_p2 = scmp.lt.s32.totalorder %s979_s27, 3 }
   0xf   : > { %s981_s10 = smov [#allocation7]   ;;  %s1242_s3 = sld [smem:[#allocation21_spill]] }
  0x10   : > { %p1055_p3 = pnand %p638_p0, %p215_p2  ;;  %s228_s11 = sshll.u32 %s981_s10, 4  ;;  %s229_s11 = int_to_ptr.vmem [resolvable:$true] %s228_s11 }
  0x11   : > { %s1244_s5 = sld [smem:[#allocation22_spill]]  ;;  %s982_s19 = smov [#allocation8]  }
  0x12   : > { %p679_p4 = pneg %p1055_p3  ;;  %s242_s20 = sshll.u32 %s982_s19, 4  ;;  %s243_s20 = int_to_ptr.vmem [resolvable:$true] %s242_s20 }
  0x13   : > { %s226_s30 = sshll.u32 %s1240_s2, 4  ;;  %s983_s21 = smov 128   ;;  %s227_s30 = int_to_ptr.hbm [resolvable:$true] %s226_s30 }
  0x14   : > { %p1067_p6 = pnand %p679_p4, %p48_p1  ;;  %s984_s22 = smov 8  }
  0x15   : > { %s240_s14 = sshll.u32 %s1242_s3, 4  ;;  %s985_s23 = smov [#allocation10]   ;;  %s241_s14 = int_to_ptr.hbm [resolvable:$true] %s240_s14 }
  0x16   : > { %682 = dma.hbm_to_vmem [thread:$0]  (!%p1067_p6), %s227_s30, 256, %s229_s11, [#allocation6], %s983_s21, %s983_s21, %s984_s22  }
  0x17   : > { %s257_s18 = sshll.u32 %s1244_s5, 4  ;;  %s259_s28 = sshll.u32 %s985_s23, 4  ;;  %s258_s18 = int_to_ptr.hbm [resolvable:$true] %s257_s18  ;;  %s260_s28 = int_to_ptr.vmem [resolvable:$true] %s259_s28 }
  0x18   : > { %685 = dma.hbm_to_vmem [thread:$0]  (!%p1067_p6), %s241_s14, 256, %s243_s20, [#allocation9], %s983_s21, %s983_s21, %s984_s22  }
  0x19   : > { %688 = dma.hbm_to_vmem [thread:$0]  (!%p1067_p6), %s258_s18, 512, %s260_s28, [#allocation9], %s983_s21, %s983_s21, %s984_s22  }
  0x1a   : > { %s637_s29 = sadd.s32 4294967294, %s979_s27   ;;  %s1082_s10 = sadd.s32 1, %s979_s27  }
  0x1b   : > { %1245 = sst [smem:[#allocation18_spill]] %s1082_s10  ;;  %s34_s12 = sadd.s32 1, %s975_s26 }
  0x1c   : > { %s31_s30 = ssub.s32 %s979_s27, %s1082_s10  ;;  %p41_p7 = scmp.ne.s32.totalorder %s975_s26, %s971_s25 }
  0x1d   : > { %p32_p8 = scmp.eq.s32.totalorder %s31_s30, 0  ;;  %p42_p9 = scmp.eq.s32.totalorder %s979_s27, 0 }
  0x1e   : > { %p47_p10 = scmp.ne.s32.totalorder %s971_s25, %s967_s24  ;;  %p202_p11 = scmp.eq.s32.totalorder %s1050_s8, 1 }
  0x1f   : > { %s1094_s11 = scalar_select %p32_p8, %s975_s26, %s34_s12  }
  0x20   : > { %p1096_p12 = por %p42_p9, %p41_p7  ;;  %p1102_p13 = por %p48_p1, %p47_p10 }
  0x21   : > { %1246 = sst [smem:[#allocation19_spill]] %s1094_s11  ;;  %p1106_p0 = por %p202_p11, %p41_p7 }
  0x22   : > { %p208_p2 = scmp.eq.s32.totalorder %s637_s29, 1  ;;  %p703_p4 = scmp.lt.s32.totalorder %s979_s27, 2 }
  0x23   : > { %s276_s16 = sand.u32 1, %s975_s26   ;;  %s644_s19 = sshll.u32 %s979_s27, 3 }
  0x24   : > { %p1112_p6 = por %p208_p2, %p47_p10  ;;  %s643_s18 = sshll.u32 %s276_s16, 3 }
  0x25   : > { %s284_s22 = scalar_lea.hbm %s1225_s0, %s644_s19  ;;  %s280_s28 = scalar_lea.vmem [#allocation2], %s643_s18 }
  0x26   : > { %s286_s23 = sshll.u32 %s284_s22, 4  ;;  %s288_s12 = sshll.u32 %s280_s28, 4  ;;  %s287_s23 = int_to_ptr.hbm [resolvable:$true] %s286_s23  ;;  %s289_s12 = int_to_ptr.vmem [resolvable:$true] %s288_s12 }
  0x27   : > { %p1122_p7 = pnand %p703_p4, %p1096_p12  ;;  %s303_s3 = scalar_lea.hbm %s1226_s1, %s644_s19 }
  0x28   : > { %s295_s5 = sand.u32 1, %s979_s27   ;;  %s277_s11 = scalar_lea.sflag [#allocation3], %s276_s16 }
  0x29   : > { %s841_s20 = sshra.s32 %s287_s23, 4  ;;  %p845_p9 = pneg %p1122_p7  ;;  %s842_s20 = int_to_ptr.hbm [resolvable:$true] %s841_s20 }
  0x2a   : > { %s843_s21 = scalar_lea.hbm %s842_s20, 8  ;;  %s848_s28 = scalar_lea.hbm %s1225_s0, 16 }
  0x2b   : > { %p844_p8 = scmp.ne.s32.totalorder %s842_s20, %s843_s21  ;;  %p849_p12 = scmp.lt.s32.totalorder %s842_s20, %s1225_s0 }
  0x2c   : > { %p850_p2 = scmp.lt.s32.totalorder %s848_s28, %s843_s21 }
  0x2d   : > { %p846_p10 = pnand %p845_p9, %p844_p8 }
  0x2e   : > { %p851_p4 = por %p850_p2, %p849_p12 }
  0x2f   : > { %p847_p11 = pneg %p846_p10 }
  0x31   : > { %p852_p5 = pnand %p851_p4, %p847_p11 }
  0x33   : > { %855 = shalt.err (!%p852_p5)
}
  0x34   : > { %692 = dma.hbm_to_vmem [thread:$0]  (!%p1122_p7), %s287_s23, 128, %s289_s12, %s277_s11  }
  0x35   : > { %s305_s16 = sshll.u32 %s303_s3, 4  ;;  %s299_s19 = scalar_lea.vmem [#allocation5], %s643_s18  ;;  %s306_s16 = int_to_ptr.hbm [resolvable:$true] %s305_s16 }
  0x36   : > { %s307_s26 = sshll.u32 %s299_s19, 4  ;;  %s296_s10 = scalar_lea.sflag [#allocation6], %s295_s5  ;;  %s308_s26 = int_to_ptr.vmem [resolvable:$true] %s307_s26 }
  0x37   : > { %s871_s13 = sshra.s32 %s306_s16, 4  ;;  %s878_s28 = scalar_lea.hbm %s1226_s1, 16  ;;  %s872_s13 = int_to_ptr.hbm [resolvable:$true] %s871_s13 }
  0x38   : > { %s873_s22 = scalar_lea.hbm %s872_s13, 8  ;;  %p879_p5 = scmp.lt.s32.totalorder %s872_s13, %s1226_s1 }
  0x39   : > { %p874_p8 = scmp.ne.s32.totalorder %s872_s13, %s873_s22  ;;  %p880_p11 = scmp.lt.s32.totalorder %s878_s28, %s873_s22 }
  0x3b   : > { %p876_p10 = pnand %p874_p8, %p845_p9  ;;  %p881_p2 = por %p880_p11, %p879_p5 }
  0x3d   : > { %p877_p12 = pneg %p876_p10 }
  0x3f   : > { %p882_p4 = pnand %p881_p2, %p877_p12 }
  0x41   : > { %885 = shalt.err (!%p882_p4)
}
  0x42   : > { %695 = dma.hbm_to_vmem [thread:$0]  (!%p1122_p7), %s306_s16, 128, %s308_s26, %s296_s10  }
  0x43   : > { %316 = sbr.rel (%p1055_p3) target bundleno = 509 (0x1fd), region = 48  ;;  %s1157_s3 = sand.u32 (!%p1055_p3), 1, %s971_s25  }
  0x44   : > { %s1160_s5 = sshll.u32 (!%p1055_p3), %s1157_s3, 3  ;;  %s319_s18 = scalar_lea.sflag (!%p1055_p3), [#allocation3], %s1157_s3 }
  0x45   : > { %s322_s23 = scalar_lea.vmem (!%p1055_p3), [#allocation2], %s1160_s5 }
  0x48   : > { %946 = dma.done.wait (%p1102_p13), %s319_s18, 128  }
  0x49   : > { %948 = vsyncadd (%p1102_p13), %s319_s18, 4294967168  ;;  %s328_s26 = sand.u32 1, %s1050_s8   ;;  %s332_s10 = scalar_lea.vmem [#allocation5], %s1160_s5 }
  0x4a   : > { %s329_s9 = scalar_lea.sflag [#allocation6], %s328_s26 }
  0x4b   : > { %950 = dma.done.wait (%p1102_p13), %s329_s9, 128  }
  0x4c   : > { %952 = vsyncadd (%p1102_p13), %s329_s9, 4294967168 }
  0x4d   : > { %954 = dma.done.wait (%p48_p1), [#allocation6], 256  }
  0x4e   : > { %956 = vsyncadd (%p48_p1), [#allocation6], 4294967040 }
  0x4f   : > { %958 = dma.done.wait (%p48_p1), [#allocation9], 768  }
  0x50   : > { %960 = vsyncadd (%p48_p1), [#allocation9], 4294966528  ;;  %v389_v0 = vld [vmem:[#allocation8 + $0x8] sm:$0xff]  ;;  %v386_v1 = vld [vmem:[#allocation7 + $0x8] sm:$0xff]  ;;  %vm390_vm0 = vcmask 130048   ;;  %vm443_vm1 = vcmask 261120  }
  0x51   : > { %v388_v2 = vld [vmem:[#allocation8] sm:$0xff]  ;;  %408 = vmatpush.msra.mxu0 %v389_v0  ;;  %431 = vmatpush.msra.mxu1 %v386_v1  ;;  %v385_v3 = vld [vmem:[#allocation7] sm:$0xff]  ;;  %v471_v15 = vld [vmem:[#allocation10 + $0x18] sm:$0xff]  ;;  %s658_s29 = sshll.u32 %s1050_s8, 3  ;;  %s383_s20 = scalar_lea.vmem [#allocation11], %s1160_s5 }
  0x52   : > { %v387_v4 = vld [vmem:[%s332_s10] sm:$0xff]  ;;  %v384_v5 = vld [vmem:[%s322_s23] sm:$0xff]  ;;  %491 = vmatpush.msra.mxu2 %v471_v15  ;;  %s511_s19 = scalar_lea.hbm %s1232_s7, %s658_s29  ;;  %s513_s21 = sshll.u32 %s383_s20, 4  ;;  %s514_s21 = int_to_ptr.vmem [resolvable:$true] %s513_s21 }
  0x53   : > { %409 = vmatpush.msra.mxu0 %v388_v2  ;;  %432 = vmatpush.msra.mxu1 %v385_v3  ;;  %v745_v6 = vld [vmem:[%s1229_s4] ss:$0 sm:$0xff]  ;;  %v470_v16 = vld [vmem:[#allocation10 + $0x10] sm:$0xff]  ;;  %v469_v17 = vld [vmem:[#allocation10 + $0x8] sm:$0xff]  ;;  %s515_s28 = sshll.u32 %s511_s19, 4  ;;  %s501_s2 = scalar_lea.sflag [#allocation4], %s1157_s3  ;;  %s516_s28 = int_to_ptr.hbm [resolvable:$true] %s515_s28 }
  0x54   : > { %654 = vmatmul.msk.f32.vlgmr.msra.gmra.mxu0 %vm390_vm0, %v387_v4  ;;  %655 = vmatmul.msk.f32.vlgmr.msra.gmra.mxu1 %vm390_vm0, %v384_v5  ;;  %v468_v18 = vld [vmem:[#allocation10] sm:$0xff]  ;;  %s915_s11 = sshra.s32 %s516_s28, 4  ;;  %s921_s26 = scalar_lea.hbm %s1232_s7, 16  ;;  %s916_s11 = int_to_ptr.hbm [resolvable:$true] %s915_s11 }
  0x55   : > { %492 = vmatpush.msra.mxu2 %v470_v16  ;;  %v746_v35 = vld [vmem:[%s1231_s6] ss:$0 sm:$0xff]  ;;  %s917_s8 = scalar_lea.hbm %s916_s11, 8  ;;  %p922_p7 = scmp.lt.s32.totalorder %s916_s11, %s1232_s7 }
  0x56   : > { %p918_p1 = scmp.ne.s32.totalorder %s916_s11, %s917_s8  ;;  %p923_p9 = scmp.lt.s32.totalorder %s921_s26, %s917_s8 }
  0x57   : > { %493 = vmatpush.msra.mxu2 %v469_v17 }
  0x58   : > { %p919_p3 = pnand %p918_p1, %p1106_p0  ;;  %p924_p8 = por %p923_p9, %p922_p7 }
  0x59   : > { %494 = vmatpush.msra.mxu2 %v468_v18 }
  0x5a   : > { %p920_p13 = pneg %p919_p3 }
  0x5c   : > { %p925_p10 = pnand %p924_p8, %p920_p13 }
  0xd1   : > { %v411_v7 = vpop.f32.mrf.mxu0  ;;  %v434_v8 = vpop.f32.mrf.mxu1 }
  0xd2   : > { %v435_v9 = vadd.f32 %v434_v8, %v411_v7 }
  0xd4   : > { %v441_v10 = vadd.f32 %v745_v6, %v435_v9 }
  0xd6   : > { %747 = vtanh.f32 %v441_v10 }
  0xdc   : > { %v748_v11 = vpop.eup %747 }
  0xdd   : > { %v444_v12 = vsel %vm443_vm1, %v748_v11, 0.0  ;;  %v448_v13 = vmul.f32 %v748_v11, %v748_v11 }
  0xde   : > { %445 = vadd.xlane.f32.xlu0 %v444_v12 }
  0xdf   : > { %v449_v14 = vsel %vm443_vm1, %v448_v13, 0.0 }
  0xe6   : > { %450 = vadd.xlane.f32.xlu0 %v449_v14 }
 0x151   : > { %v446_v19 = vpop.xlane.xlu0 %445 }
 0x152   : > { %v447_v20 = vmul.f32 0.03125, %v446_v19 }
 0x154   : > { %v453_v22 = vmul.f32 %v447_v20, %v447_v20  ;;  %v455_v32 = vsub.f32 %v748_v11, %v447_v20 }
 0x159   : > { %v451_v21 = vpop.xlane.xlu0 %450 }
 0x15a   : > { %v452_v23 = vmul.f32 0.03125, %v451_v21 }
 0x15c   : > { %v454_v24 = vsub.f32 %v452_v23, %v453_v22 }
 0x15e   : > { %v456_v25 = vadd.f32 1e-05, %v454_v24 }
 0x160   : > { %749 = vrsqrt.f32 %v456_v25  ;;  %vm463_vm3 = vweird.f32 %v456_v25 }
 0x166   : > { %v750_v26 = vpop.eup %749 }
 0x167   : > { %v458_v27 = vmul.f32 %v750_v26, %v456_v25  ;;  %vm464_vm2 = vweird.f32 %v750_v26 }
 0x168   : > { %vm465_vm4 = vmor %vm463_vm3, %vm464_vm2 }
 0x169   : > { %v459_v28 = vmul.f32 %v750_v26, %v458_v27 }
 0x16b   : > { %v460_v29 = vmul.f32 0.5, %v459_v28 }
 0x16d   : > { %v461_v30 = vsub.f32 1.5, %v460_v29 }
 0x16f   : > { %v462_v31 = vmul.f32 %v750_v26, %v461_v30 }
 0x171   : > { %v466_v33 = vsel %vm465_vm4, %v750_v26, %v462_v31 }
 0x172   : > { %v467_v34 = vmul.f32 %v466_v33, %v455_v32 }
 0x174   : > { %656 = vmatmul.msk.f32.vlgmr.msra.gmra.mxu2 %vm443_vm1, %v467_v34 }
 0x1f7   : > { %v496_v36 = vpop.f32.mrf.mxu2 }
 0x1f8   : > { %v497_v37 = vadd.f32 %v746_v35, %v496_v36 }
 0x1fa   : > { %499 = vst [vmem:[%s383_s20] sm:$0xff] %v497_v37 }
 0x1fb   : > { %928 = shalt.err (!%p925_p10)
}
 0x1fc   : > { %677 = dma.vmem_to_hbm [thread:$0]  (%p1106_p0), %s514_s21, 128, %s516_s28, %s501_s2  }
 0x1fd PF: > { %s527_s3 = sand.u32 1, %s967_s24   ;;  %p1252_p12 = scmp.ge.s32.totalorder %s979_s27, 2 }
 0x1fe   : > { %s528_s10 = scalar_lea.sflag [#allocation4], %s527_s3 }
 0x1ff   : > { %p697_p5 = pnand %p1252_p12, %p1112_p6 }
 0x201   : > { %p698_p11 = pneg %p697_p5 }
 0x203   : > { %962 = dma.done.wait (%p698_p11), %s528_s10, 128  }
 0x204   : > { %964 = vsyncadd (%p698_p11), %s528_s10, 4294967168  ;;  %s1253_s27 = sld [smem:[#allocation18_spill]]  ;;  %s1256_s24 = smov %s971_s25 }
 0x205   : > { %s1254_s14 = sld [smem:[#allocation17_spill]] }
 0x206   : > { %s1255_s26 = sld [smem:[#allocation19_spill]] }
 0x20a   : > { %p24_p2 = scmp.ge.s32.totalorder %s1253_s27, 4  }
 0x20b   : > { %s1257_s25 = smov %s1254_s14 }
 0x20c   :  { %26 = sbr.rel (!%p24_p2) target bundleno = 12 (0xc), region = 118 }
 0x211   :  { %534 = vsyncpa [#allocation3], 1 }
 0x212   :  { %536 = vsyncpa [#allocation3 + $0x1], 1 }
 0x213   :  { %537 = vsyncpa [#allocation6], 1 }
 0x214   :  { %539 = vsyncpa [#allocation6 + $0x1], 1 }
 0x215   :  { %540 = vsyncpa [#allocation9], 1 }
 0x216   :  { %541 = vsyncpa [#allocation4], 1 }
 0x217   :  { %543 = vsyncpa [#allocation4 + $0x1], 1 }

</bundles_post_ra>
